<compile_context>
chip_gen: v6e
topology: v6e:2x2x1
jax: 0.10.0
libtpu: 0.0.40
codegen_flags: <defaults>
</compile_context>

<pallas_src>
import functools

import jax
import jax.numpy as jnp
import numpy as np
from jax import lax
from jax.experimental import pallas as pl
from jax.experimental.pallas import tpu as pltpu


_VMEM_BLOCK_BUDGET = 20 * 1024 * 1024   # bytes of live kernel blocks we aim for
_VMEM_LIMIT = 32 * 1024 * 1024          # explicit scoped-VMEM limit (safe on v5e/v6e/v7x)
_LANE_CAP = 4096                        # max lane-tile width


# --------------------------------------------------------------------------
# Shared elementwise math (operates on matching real/imag tiles).
# --------------------------------------------------------------------------
def _complex_relu_math(real, imag, relu_type, bias):
    if relu_type == 'zReLU':
        # 0 < angle(z) < pi/2  <=>  real > 0 and imag > 0 (strict).
        mask = jnp.logical_and(real > 0, imag > 0)
        zero = jnp.zeros((), real.dtype)
        return jnp.where(mask, real, zero), jnp.where(mask, imag, zero)

    if relu_type == 'sReLU':
        # -pi/2 < angle(z) < pi/2  <=>  real > 0.
        mask = real > 0
        zero = jnp.zeros((), real.dtype)
        return jnp.where(mask, real, zero), jnp.where(mask, imag, zero)

    if relu_type == 'modReLU':
        # relu(|z| + bias) * exp(i*angle(z)) == (real, imag) * max(1 + bias/|z|, 0)
        r32 = real.astype(jnp.float32)
        i32 = imag.astype(jnp.float32)
        r2 = r32 * r32 + i32 * i32
        inv_r = lax.rsqrt(r2)                      # single EUP transcendental
        scale = jnp.maximum(1.0 + jnp.float32(bias) * inv_r, 0.0)
        tiny = jnp.float32(np.finfo(np.float32).tiny)
        small = r2 < tiny                          # guard rsqrt of 0 / subnormal
        out_r = jnp.where(small, jnp.maximum(jnp.float32(bias), 0.0), r32 * scale)
        out_i = jnp.where(small, jnp.float32(0.0), i32 * scale)
        return out_r, out_i

    if relu_type in ('softplus', 'softplus2'):
        # log(c + c*exp(z)); c = 1 (softplus) or 1/2 (softplus2).
        # Factor out e^{max(real,0)} so exp never overflows.
        c = 1.0 if relu_type == 'softplus' else 0.5
        r32 = real.astype(jnp.float32)
        i32 = imag.astype(jnp.float32)
        a = jnp.maximum(r32, 0.0)
        e_na = jnp.exp(-a)                         # <= 1
        e_ra = jnp.exp(r32 - a)                    # <= 1
        wr = c * e_na + c * e_ra * jnp.cos(i32)
        wi = c * e_ra * jnp.sin(i32)
        out_r = a + 0.5 * jnp.log(wr * wr + wi * wi)
        out_i = jnp.arctan2(wi, wr)
        return out_r, out_i

    # default: CReLU — independent relu on real and imag.
    zero = jnp.zeros((), real.dtype)
    return jnp.maximum(real, zero), jnp.maximum(imag, zero)


# --------------------------------------------------------------------------
# Kernels
# --------------------------------------------------------------------------
def _cr_kernel_2d(real_ref, imag_ref, o_ref, stash_ref, *, relu_type, bias):
    """Fast path: dense 2D tiles; innermost grid axis c picks real/imag output."""
    c = pl.program_id(2)

    @pl.when(c == 0)
    def _():
        out_r, out_i = _complex_relu_math(real_ref[...], imag_ref[...],
                                          relu_type, bias)
        o_ref[...] = out_r.astype(o_ref.dtype)        # dense full-block store
        stash_ref[...] = out_i.astype(stash_ref.dtype)

    @pl.when(c == 1)
    def _():
        o_ref[...] = stash_ref[...]                   # dense full-block store


def _cr_kernel_3d(x_ref, o_ref, *, relu_type, bias):
    """Fallback path: (TB, 2, HW) full-extent block (always-legal block dims)."""
    real = x_ref[:, 0, :]
    imag = x_ref[:, 1, :]
    out_r, out_i = _complex_relu_math(real, imag, relu_type, bias)
    o_ref[:, 0, :] = out_r.astype(o_ref.dtype)
    o_ref[:, 1, :] = out_i.astype(o_ref.dtype)


# --------------------------------------------------------------------------
# Wrappers
# --------------------------------------------------------------------------
def _fast_path(x, relu_type, bias, interpret):
    n, _, h, w = x.shape
    hw = h * w
    dtype = x.dtype
    itemsize = dtype.itemsize
    sub = 32 // itemsize                     # sublane quantum: 8 (f32) / 16 (bf16)

    # Lane tile: largest multiple-of-128 divisor of HW, capped (lane-dense
    # blocks with no trailing partial lane block).
    if hw <= _LANE_CAP:
        t_lane = hw
    else:
        t_lane = 128
        for cand in range(_LANE_CAP, 127, -128):
            if hw % cand == 0:
                t_lane = cand
                break
    lane_blocks = hw // t_lane

    # Batch tile from an accurate VMEM budget: 3 double-buffered dense blocks
    # (real in, imag in, out) + 1 persistent stash, all (tb, t_lane).
    per_row_bytes = 7 * t_lane * itemsize
    tb = max(sub, (_VMEM_BLOCK_BUDGET // per_row_bytes) // sub * sub)
    tb = min(n, tb)
    batch_blocks = pl.cdiv(n, tb)

    # v7x megacore: make sure a non-trivial problem has >= 2 parallel steps.
    if batch_blocks * lane_blocks == 1 and 2 * n * hw * itemsize >= (2 << 20):
        if n >= 2 * sub:
            tb = ((pl.cdiv(n, 2) + sub - 1) // sub) * sub
            batch_blocks = pl.cdiv(n, tb)
        elif t_lane % 256 == 0:
            t_lane //= 2
            lane_blocks = hw // t_lane

    x2 = x.reshape(n, 2 * hw)                # free reshape: [real | imag] per row
    kernel = functools.partial(_cr_kernel_2d, relu_type=relu_type, bias=bias)

    extra = {}
    if not interpret:
        extra['compiler_params'] = pltpu.CompilerParams(
            dimension_semantics=("parallel", "parallel", "arbitrary"),
            vmem_limit_bytes=_VMEM_LIMIT)

    out2 = pl.pallas_call(
        kernel,
        out_shape=jax.ShapeDtypeStruct((n, 2 * hw), dtype),
        grid=(batch_blocks, lane_blocks, 2),
        in_specs=[
            # real half: columns [0, HW)
            pl.BlockSpec((tb, t_lane), lambda i, j, c: (i, j)),
            # imag half: columns [HW, 2*HW)
            pl.BlockSpec((tb, t_lane),
                         lambda i, j, c, lb=lane_blocks: (i, lb + j)),
        ],
        # c == 0 writes the real half, c == 1 the imag half.
        out_specs=pl.BlockSpec((tb, t_lane),
                               lambda i, j, c, lb=lane_blocks: (i, c * lb + j)),
        scratch_shapes=[pltpu.VMEM((tb, t_lane), dtype)],
        interpret=interpret,
        **extra,
    )(x2, x2)
    return out2.reshape(n, 2, h, w)


def _fallback_path(x, relu_type, bias, interpret):
    n, _, h, w = x.shape
    hw = h * w
    dtype = x.dtype

    x3 = x.reshape(n, 2, hw)                 # free reshape
    # Accurate budget: channel axis (2) sits in the sublane slot and pads to
    # 32 bytes worth of sublanes, for BOTH the input and output block, each
    # double-buffered:  2 blocks * 2 buffers * (32 * hw) bytes per batch row.
    per_row_bytes = 128 * hw
    tb = max(1, min(n, _VMEM_BLOCK_BUDGET // max(per_row_bytes, 1)))

    kernel = functools.partial(_cr_kernel_3d, relu_type=relu_type, bias=bias)
    extra = {}
    if not interpret:
        extra['compiler_params'] = pltpu.CompilerParams(
            dimension_semantics=("parallel",),
            vmem_limit_bytes=_VMEM_LIMIT)

    out3 = pl.pallas_call(
        kernel,
        out_shape=jax.ShapeDtypeStruct((n, 2, hw), dtype),
        grid=(pl.cdiv(n, tb),),
        in_specs=[pl.BlockSpec((tb, 2, hw), lambda i: (i, 0, 0))],
        out_specs=pl.BlockSpec((tb, 2, hw), lambda i: (i, 0, 0)),
        interpret=interpret,
        **extra,
    )(x3)
    return out3.reshape(n, 2, h, w)


def complex_relu(x, relu_type='zReLU', bias=-1.0, *, interpret=False):
    """x: (N, 2, H, W) float array (channel 0 = real, 1 = imag)."""
    n, two, h, w = x.shape
    assert two == 2, "expected real/imag stacked on dim 1"
    hw = h * w
    bias = float(bias)
    if hw % 128 == 0:
        return _fast_path(x, relu_type, bias, interpret)
    # TODO(synk): spatial sizes that are not a multiple of 128 use the simpler
    # (TB, 2, HW) full-extent path (correct, but channel-axis sublane padding).
    return _fallback_path(x, relu_type, bias, interpret)


# --------------------------- numpy references --------------------------------
def _np_zrelu(x):
    real, imag = x[:, 0], x[:, 1]
    ang = np.angle(real + 1j * imag)
    mask = ((0 < ang) & (ang < np.pi / 2)).astype(x.dtype)
    return np.stack((real * mask, imag * mask), axis=1)


def _np_srelu(x):
    real, imag = x[:, 0], x[:, 1]
    ang = np.angle(real + 1j * imag)
    mask = ((-np.pi / 2 < ang) & (ang < np.pi / 2)).astype(x.dtype)
    return np.stack((real * mask, imag * mask), axis=1)


def _np_modrelu(x, bias=-1.0):
    real, imag = x[:, 0], x[:, 1]
    z = real + 1j * imag
    m = np.maximum(np.abs(z) + bias, 0.0)
    out = m * np.exp(1j * np.angle(z))
    return np.stack((out.real, out.imag), axis=1).astype(x.dtype)


def _np_softplus(x, c):
    real, imag = x[:, 0], x[:, 1]
    z = (real + 1j * imag).astype(np.complex64)
    wz = np.log(c + c * np.exp(z))
    return np.stack((wz.real, wz.imag), axis=1).astype(x.dtype)


def _np_crelu(x):
    return np.maximum(x, 0.0).astype(x.dtype)


if __name__ == "__main__":
    key = jax.random.PRNGKey(0)
    k1, k2 = jax.random.split(key)

    # ---- fast path: HW = 256 (multiple of 128) ----
    x = jax.random.normal(k1, (2, 2, 16, 16), dtype=jnp.float32)
    xn = np.asarray(x)

    out = jax.block_until_ready(complex_relu(x, relu_type='zReLU'))
    assert out.shape == x.shape and out.dtype == x.dtype
    np.testing.assert_allclose(np.asarray(out), _np_zrelu(xn), rtol=1e-6, atol=1e-6)

    out = jax.block_until_ready(complex_relu(x, relu_type='sReLU'))
    np.testing.assert_allclose(np.asarray(out), _np_srelu(xn), rtol=1e-6, atol=1e-6)

    out = jax.block_until_ready(complex_relu(x, relu_type='modReLU'))
    np.testing.assert_allclose(np.asarray(out), _np_modrelu(xn), rtol=1e-4, atol=1e-5)

    out = jax.block_until_ready(complex_relu(x, relu_type='relu'))
    np.testing.assert_allclose(np.asarray(out), _np_crelu(xn), rtol=1e-6, atol=1e-6)

    # bf16 exercises the no-upcast compare/select path (native bf16 on v6e/v7x).
    xb = x.astype(jnp.bfloat16)
    out_b = jax.block_until_ready(complex_relu(xb, relu_type='zReLU'))
    ref_b = _np_zrelu(np.asarray(xb).astype(np.float32))
    np.testing.assert_allclose(np.asarray(out_b).astype(np.float32), ref_b,
                               rtol=0, atol=0)

    # ---- fallback path: HW = 60 (not a multiple of 128) ----
    y = jax.random.normal(k2, (3, 2, 6, 10), dtype=jnp.float32)
    yn = np.asarray(y)
    out = jax.block_until_ready(complex_relu(y, relu_type='zReLU'))
    np.testing.assert_allclose(np.asarray(out), _np_zrelu(yn), rtol=1e-6, atol=1e-6)
    out = jax.block_until_ready(complex_relu(y, relu_type='modReLU'))
    np.testing.assert_allclose(np.asarray(out), _np_modrelu(yn), rtol=1e-4, atol=1e-5)

    # softplus / softplus2 numerics validated in interpret mode (checks the
    # overflow-safe complex-log formulation without making the TPU smoke test
    # depend on sin/cos/atan2 Mosaic lowering).
    out = np.asarray(complex_relu(y, relu_type='softplus', interpret=True))
    np.testing.assert_allclose(out, _np_softplus(yn, 1.0), rtol=1e-4, atol=1e-4)
    out = np.asarray(complex_relu(y, relu_type='softplus2', interpret=True))
    np.testing.assert_allclose(out, _np_softplus(yn, 0.5), rtol=1e-4, atol=1e-4)

    print("KERNEL_OK")
</pallas_src>

<mosaic_0001>
module attributes {stable_mosaic.version = 11 : i64} {
  func.func @_cr_kernel_2d(%arg0: i32, %arg1: i32, %arg2: i32, %arg3: memref<2x256xf32, #tpu.memory_space<vmem>>, %arg4: memref<2x256xf32, #tpu.memory_space<vmem>>, %arg5: memref<2x256xf32, #tpu.memory_space<vmem>>, %arg6: memref<2x256xf32, #tpu.memory_space<vmem>>) attributes {dimension_semantics = [#tpu.dimension_semantics<parallel>, #tpu.dimension_semantics<parallel>, #tpu.dimension_semantics<arbitrary>], iteration_bounds = array<i64: 1, 1, 2>, scalar_prefetch = 0 : i64, scratch_operands = 1 : i64, tpu.core_type = #tpu.core_type<tc>, window_params = [{transform_indices = @transform_0, window_bounds = array<i64: 2, 256>}, {transform_indices = @transform_1, window_bounds = array<i64: 2, 256>}, {transform_indices = @transform_2, window_bounds = array<i64: 2, 256>}]} {
    %c0_i32 = arith.constant 0 : i32
    %0 = arith.cmpi eq, %arg2, %c0_i32 : i32
    %1 = arith.extui %0 : i1 to i32
    %c0_i32_0 = arith.constant 0 : i32
    %2 = arith.cmpi ne, %1, %c0_i32_0 : i32
    scf.if %2 {
      %c0 = arith.constant 0 : index
      %c0_2 = arith.constant 0 : index
      %6 = vector.load %arg3[%c0, %c0_2] : memref<2x256xf32, #tpu.memory_space<vmem>>, vector<2x256xf32>
      %c0_3 = arith.constant 0 : index
      %c0_4 = arith.constant 0 : index
      %7 = vector.load %arg4[%c0_3, %c0_4] : memref<2x256xf32, #tpu.memory_space<vmem>>, vector<2x256xf32>
      %cst = arith.constant 0.000000e+00 : f32
      %8 = vector.broadcast %cst : f32 to vector<2x256xf32>
      %9 = arith.cmpf ogt, %6, %8 : vector<2x256xf32>
      %cst_5 = arith.constant 0.000000e+00 : f32
      %10 = vector.broadcast %cst_5 : f32 to vector<2x256xf32>
      %11 = arith.cmpf ogt, %7, %10 : vector<2x256xf32>
      %12 = arith.andi %9, %11 : vector<2x256xi1>
      %cst_6 = arith.constant 0.000000e+00 : f32
      %13 = vector.broadcast %cst_6 : f32 to vector<2x256xf32>
      %14 = arith.select %12, %6, %13 : vector<2x256xi1>, vector<2x256xf32>
      %cst_7 = arith.constant 0.000000e+00 : f32
      %15 = vector.broadcast %cst_7 : f32 to vector<2x256xf32>
      %16 = arith.select %12, %7, %15 : vector<2x256xi1>, vector<2x256xf32>
      %c0_8 = arith.constant 0 : index
      %c0_9 = arith.constant 0 : index
      %17 = vector.load %arg5[%c0_8, %c0_9] : memref<2x256xf32, #tpu.memory_space<vmem>>, vector<2x256xf32>
      tpu.vector_store %arg5[%c0_8, %c0_9], %14 {strides = array<i32>} : memref<2x256xf32, #tpu.memory_space<vmem>>, vector<2x256xf32>,
      %c0_10 = arith.constant 0 : index
      %c0_11 = arith.constant 0 : index
      %18 = vector.load %arg6[%c0_10, %c0_11] : memref<2x256xf32, #tpu.memory_space<vmem>>, vector<2x256xf32>
      tpu.vector_store %arg6[%c0_10, %c0_11], %16 {strides = array<i32>} : memref<2x256xf32, #tpu.memory_space<vmem>>, vector<2x256xf32>,
    } else {
    }
    %c1_i32 = arith.constant 1 : i32
    %3 = arith.cmpi eq, %arg2, %c1_i32 : i32
    %4 = arith.extui %3 : i1 to i32
    %c0_i32_1 = arith.constant 0 : i32
    %5 = arith.cmpi ne, %4, %c0_i32_1 : i32
    scf.if %5 {
      %c0 = arith.constant 0 : index
      %c0_2 = arith.constant 0 : index
      %6 = vector.load %arg6[%c0, %c0_2] : memref<2x256xf32, #tpu.memory_space<vmem>>, vector<2x256xf32>
      %c0_3 = arith.constant 0 : index
      %c0_4 = arith.constant 0 : index
      %7 = vector.load %arg5[%c0_3, %c0_4] : memref<2x256xf32, #tpu.memory_space<vmem>>, vector<2x256xf32>
      tpu.vector_store %arg5[%c0_3, %c0_4], %6 {strides = array<i32>} : memref<2x256xf32, #tpu.memory_space<vmem>>, vector<2x256xf32>,
    } else {
    }
    return
  }
  func.func @transform_0(%arg0: i32, %arg1: i32, %arg2: i32) -> (i32, i32) {
    %c0_i32 = arith.constant 0 : i32
    return %arg0, %arg1 : i32, i32
  }
  func.func @transform_1(%arg0: i32, %arg1: i32, %arg2: i32) -> (i32, i32) {
    %c1_i32 = arith.constant 1 : i32
    %0 = arith.addi %c1_i32, %arg1 : i32
    %c0_i32 = arith.constant 0 : i32
    return %arg0, %0 : i32, i32
  }
  func.func @transform_2(%arg0: i32, %arg1: i32, %arg2: i32) -> (i32, i32) {
    %c1_i32 = arith.constant 1 : i32
    %0 = arith.muli %arg2, %c1_i32 : i32
    %1 = arith.addi %0, %arg1 : i32
    %c0_i32 = arith.constant 0 : i32
    return %arg0, %1 : i32, i32
  }
}

</mosaic_0001>

<bundles_post_ra>
// kernel: tpu_custom_call.1
= control target key start
LH: loop header
LB: loop body
LE: loop exit
PB: predicated region body
PF: predicated region fallthrough
CT: control target
= control target key end

     0   :  { %7 = vsyncpa [#allocation4], 0  ;;  %s727_s0 = inlined_call_operand.hbm [shape: f32[2,512], index: 0, kind: input, shape index: {}]   ;;  %s728_s1 = inlined_call_operand.hbm [shape: f32[2,512], index: 1, kind: input, shape index: {}]   ;;  %s729_s2 = inlined_call_operand.hbm [shape: f32[2,512], index: 2, kind: output, shape index: {}]  }
   0x1   :  { %8 = vsyncpa [#allocation7], 0 }
   0x2   :  { %9 = vsyncpa [#allocation5], 0 }
   0x3   :  { %11 = vsyncpa [#allocation5 + $0x1], 0  ;;  %s587_s9 = smov 0   ;;  %s589_s10 = smov 0  }
   0x4   :  { %s591_s11 = smov 0   ;;  %s593_s12 = smov 0  }
   0x5   :  { %s595_s13 = smov 0   ;;  %s597_s14 = smov 0  }
   0x6 LB: > { %s335_s15 = sadd.s32 4294967295, %s567_s14   ;;  %s336_s16 = sadd.s32 4294967294, %s567_s14   ;;  %s567_s14 = sphi %s597_s14, %s17_s14   ;;  %s563_s13 = sphi %s595_s13, %s747_s13   ;;  %s559_s12 = sphi %s593_s12, %s746_s12   ;;  %s555_s11 = sphi %s591_s11, %s745_s11   ;;  %s551_s10 = sphi %s589_s10, %s744_s10   ;;  %s547_s9 = sphi %s587_s9, %s743_s9  }
   0x7   : > { %s29_s17 = sadd.s32 1, %s563_s13  ;;  %s105_s18 = sadd.s32 1, %s555_s11 }
   0x8   : > { %p30_p0 = scmp.ge.s32.totalorder %s29_s17, 2  ;;  %p115_p1 = scmp.ne.s32.totalorder %s555_s11, %s551_s10 }
   0x9   : > { %p116_p2 = scmp.eq.s32.totalorder %s335_s15, 1  ;;  %p121_p3 = scmp.ne.s32.totalorder %s551_s10, %s547_s9 }
   0xa   : > { %s749_s17 = smov (%p30_p0, %s29_s17), 0  ;;  %p122_p5 = scmp.eq.s32.totalorder %s336_s16, 1 }
   0xb   : > { %p627_p4 = por %p116_p2, %p115_p1  ;;  %s101_s20 = ssub.s32 %s563_s13, %s749_s17 }
   0xc   : > { %p337_p6 = scmp.ge.s32.totalorder %s567_s14, 1  ;;  %p103_p7 = scmp.eq.s32.totalorder %s101_s20, 0 }
   0xd   : > { %s734_s19 = scalar_select %p627_p4, 1, 0 }
   0xe   : > { %p634_p8 = por %p122_p5, %p121_p3  ;;  %p129_p9 = scmp.lt.s32.totalorder %s567_s14, 3 }
   0xf   : > { %s640_s22 = scalar_select %p103_p7, %s555_s11, %s105_s18  }
  0x10   : > { %s735_s21 = scalar_select %p634_p8, 1, 0 }
  0x11   : > { %p642_p10 = pnand %p337_p6, %p129_p9  ;;  %p646_p11 = scmp.eq.s32.totalorder %s335_s15, 0 }
  0x12   : > { %s569_s25 = smov [#allocation3]   ;;  %s570_s28 = smov [#allocation6]  }
  0x13   : > { %s736_s23 = scalar_select %p642_p10, 1, 0 }
  0x14   : > { %s737_s24 = scalar_select %p646_p11, 1, 0 }
  0x15   : > { %p362_p12 = pneg %p642_p10  ;;  %s147_s26 = sshll.u32 %s569_s25, 4  ;;  %s148_s26 = int_to_ptr.vmem [resolvable:$true] %s147_s26 }
  0x16   : > { %s164_s29 = sshll.u32 %s570_s28, 4  ;;  %s275_s4 = scalar_lea.hbm %s728_s1, 64  ;;  %s165_s29 = int_to_ptr.vmem [resolvable:$true] %s164_s29 }
  0x17   : > { %p654_p13 = pnand %p646_p11, %p362_p12  ;;  %s439_s5 = scalar_lea.vmem %s148_s26, 64 }
  0x18   : > { %p440_p1 = scmp.ne.s32.totalorder %s148_s26, %s439_s5  ;;  %p447_p5 = scmp.lt.s32.totalorder %s148_s26, %s148_s26 }
  0x19   : > { %p430_p0 = pneg %p654_p13  ;;  %p448_p6 = scmp.lt.s32.totalorder %s439_s5, %s439_s5 }
  0x1b   : > { %p442_p2 = pnand %p440_p1, %p430_p0  ;;  %p449_p7 = por %p448_p6, %p447_p5 }
  0x1d   : > { %p443_p3 = pneg %p442_p2 }
  0x1f   : > { %p450_p9 = pnand %p449_p7, %p443_p3 }
  0x21   : > { %453 = shalt.err (!%p450_p9)
}
  0x22   : > { %365 = dma.hbm_to_vmem [thread:$0]  (!%p654_p13), %s727_s0, 64, %s148_s26, [#allocation4]  }
  0x23   : > { %s467_s8 = scalar_lea.vmem %s165_s29, 64  ;;  %p475_p1 = scmp.lt.s32.totalorder %s165_s29, %s165_s29 }
  0x24   : > { %p468_p12 = scmp.ne.s32.totalorder %s165_s29, %s467_s8  ;;  %p476_p2 = scmp.lt.s32.totalorder %s467_s8, %s467_s8 }
  0x26   : > { %p470_p8 = pnand %p468_p12, %p430_p0  ;;  %p477_p11 = por %p476_p2, %p475_p1 }
  0x28   : > { %p471_p4 = pneg %p470_p8 }
  0x2a   : > { %p478_p10 = pnand %p477_p11, %p471_p4 }
  0x2c   : > { %481 = shalt.err (!%p478_p10)
}
  0x2d   : > { %368 = dma.hbm_to_vmem [thread:$0]  (!%p654_p13), %s275_s4, 64, %s165_s29, [#allocation7]  }
  0x2e   : > { %p739_p3 = scmp.ne.s32.totalorder %s736_s23, 0 }
  0x2f   : > { %p740_p5 = scmp.ne.s32.totalorder (!%p739_p3), %s737_s24, 0 }
  0x30   : > { %177 = sbr.rel (%p739_p3) target bundleno = 101 (0x65), region = 28 }
  0x35   : > { %534 = dma.done.wait (%p740_p5), [#allocation4], 64  }
  0x36   : > { %536 = vsyncadd (%p740_p5), [#allocation4], 4294967232 }
  0x37   : > { %538 = dma.done.wait (%p740_p5), [#allocation7], 64  }
  0x38   : > { %540 = vsyncadd (%p740_p5), [#allocation7], 4294967232  ;;  %s195_s15 = sand.u32 1, %s551_s10   ;;  %p344_p4 = scmp.ne.s32.totalorder %s559_s12, 0 }
  0x39   : > { %s343_s16 = sshll.u32 %s195_s15, 2 }
  0x3a   : > { %s197_s18 = scalar_lea.vmem [#allocation8], %s343_s16  ;;  %206 = sbr.rel (%p344_p4) target bundleno = 68 (0x44), region = 40 }
  0x3f   : > { %v207_v0 = vld [vmem:[#allocation3] sm:$0xf]  ;;  %v208_v1 = vld [vmem:[#allocation6] sm:$0xf] }
  0x40   : > { %vm209_vm0 = vcmp.gt.f32.partialorder %v207_v0, 0.0  ;;  %vm210_vm1 = vcmp.gt.f32.partialorder %v208_v1, 0.0 }
  0x41   : > { %vm211_vm2 = vmand %vm209_vm0, %vm210_vm1 }
  0x42   : > { %v212_v2 = vsel %vm211_vm2, %v207_v0, 0.0  ;;  %v213_v3 = vsel %vm211_vm2, %v208_v1, 0.0 }
  0x43   : > { %214 = vst [vmem:[%s197_s18] sm:$0xf] %v212_v2  ;;  %215 = vst [vmem:[#allocation2] sm:$0xf] %v213_v3 }
  0x44 PF: > { %p345_p8 = scmp.ne.s32.totalorder %s559_s12, 1 }
  0x46   : > { %219 = sbr.rel (%p345_p8) target bundleno = 77 (0x4d), region = 44 }
  0x4b   : > { %v220_v4 = vld [vmem:[#allocation2] sm:$0xf] }
  0x4c   : > { %221 = vst [vmem:[%s197_s18] sm:$0xf] %v220_v4 }
  0x4d PF: > { %s351_s20 = sshll.u32 %s559_s12, 6  ;;  %s240_s26 = sshll.u32 %s197_s18, 4  ;;  %s241_s26 = int_to_ptr.vmem [resolvable:$true] %s240_s26 }
  0x4e   : > { %s238_s25 = scalar_lea.hbm %s729_s2, %s351_s20  ;;  %s223_s27 = scalar_lea.sflag [#allocation5], %s195_s15 }
  0x4f   : > { %s483_s28 = scalar_lea.vmem %s241_s26, 64  ;;  %p741_p11 = scmp.ne.s32.totalorder %s734_s19, 0 }
  0x50   : > { %p484_p10 = scmp.ne.s32.totalorder %s241_s26, %s483_s28  ;;  %s571_s29 = smov [#allocation8]  }
  0x51   : > { %s487_s30 = sshll.u32 %s571_s29, 4  ;;  %s488_s30 = int_to_ptr.vmem [resolvable:$false] %s487_s30 }
  0x52   : > { %p485_p13 = pnand %p484_p10, %p741_p11  ;;  %s489_s3 = scalar_lea.vmem %s488_s30, 128 }
  0x53   : > { %p490_p6 = scmp.lt.s32.totalorder %s241_s26, %s488_s30  ;;  %p491_p7 = scmp.lt.s32.totalorder %s489_s3, %s483_s28 }
  0x54   : > { %p486_p0 = pneg %p485_p13 }
  0x55   : > { %p492_p9 = por %p491_p7, %p490_p6 }
  0x57   : > { %p493_p12 = pnand %p492_p9, %p486_p0 }
  0x59   : > { %496 = shalt.err (!%p493_p12)
}
  0x5a   : > { %s497_s12 = scalar_lea.hbm %s238_s25, 64  ;;  %s501_s6 = scalar_lea.hbm %s729_s2, 128 }
  0x5b   : > { %p498_p1 = scmp.ne.s32.totalorder %s238_s25, %s497_s12  ;;  %p502_p5 = scmp.lt.s32.totalorder %s238_s25, %s729_s2 }
  0x5c   : > { %p503_p4 = scmp.lt.s32.totalorder %s501_s6, %s497_s12 }
  0x5d   : > { %p499_p2 = pnand %p498_p1, %p741_p11 }
  0x5e   : > { %p504_p8 = por %p503_p4, %p502_p5 }
  0x5f   : > { %p500_p3 = pneg %p499_p2 }
  0x61   : > { %p505_p10 = pnand %p504_p8, %p500_p3 }
  0x63   : > { %508 = shalt.err (!%p505_p10)
}
  0x64   : > { %360 = dma.vmem_to_hbm [thread:$0]  (%p741_p11), %s241_s26, 64, %s238_s25, %s223_s27  }
  0x65 PF: > { %p377_p13 = scmp.ge.s32.totalorder %s567_s14, 2  ;;  %s252_s15 = sand.u32 1, %s547_s9  }
  0x66   : > { %p742_p0 = scmp.ne.s32.totalorder %s735_s21, 0  ;;  %s253_s16 = scalar_lea.sflag [#allocation5], %s252_s15 }
  0x68   : > { %p370_p6 = pnand %p377_p13, %p742_p0 }
  0x6a   : > { %p371_p7 = pneg %p370_p6 }
  0x6c   : > { %542 = dma.done.wait (%p371_p7), %s253_s16, 64  }
  0x6d   : > { %544 = vsyncadd (%p371_p7), %s253_s16, 4294967232  ;;  %s17_s14 = sadd.s32 1, %s567_s14   ;;  %s743_s9 = smov %s551_s10 }
  0x6e   : > { %p14_p9 = scmp.ge.s32.totalorder %s17_s14, 4   ;;  %s744_s10 = smov %s555_s11 }
  0x6f   : > { %s745_s11 = smov %s640_s22  ;;  %s746_s12 = smov %s563_s13 }
  0x70   : > { %s747_s13 = smov %s749_s17  ;;  %16 = sbr.rel (!%p14_p9) target bundleno = 6 (0x6), region = 79 }
  0x75   :  { %258 = vsyncpa [#allocation4], 1 }
  0x76   :  { %260 = vsyncpa [#allocation4 + $0x1], 1 }
  0x77   :  { %261 = vsyncpa [#allocation7], 1 }
  0x78   :  { %262 = vsyncpa [#allocation5], 1 }
  0x79   :  { %264 = vsyncpa [#allocation5 + $0x1], 1 }

</bundles_post_ra>
